<compile_context>
chip_gen: v5e
topology: v5e:2x2
jax: 0.10.0
libtpu: 0.0.40
codegen_flags: <defaults>
</compile_context>

<pallas_src>
import math

import jax
import jax.numpy as jnp
from jax.experimental import pallas as pl
from jax.experimental.pallas import tpu as pltpu

LANE = 128  # TPU lane width


def ensemble_kernel(x_ref, wf_ref, bf_ref, w2_ref, b2_ref, out_ref):
    # x_ref  : (tm, D)      f32   batch tile, D lane-dense
    # wf_ref : (D, 128)     f32   fused (heads @ fc1) weight, cols 8..127 zero
    # bf_ref : (1, 128)     f32   fused bias, zero-padded
    # w2_ref : (128, 128)   f32   fc2 weight, rows>=8 and cols>=2 zero
    # b2_ref : (1, 128)     f32   fc2 bias, zero-padded
    # out_ref: (tm, 128)    bf16  lane-dense output slab; logits in [:, :2]
    h = jnp.dot(x_ref[...], wf_ref[...], preferred_element_type=jnp.float32)
    h = jnp.maximum(h + bf_ref[...], 0.0)           # bias + ReLU (padded lanes stay 0)

    # TODO(synk): nn.Dropout() is identity in eval mode; training-mode masking
    # (pltpu.prng_seed + pltpu.stateful_bernoulli) intentionally not applied.

    y = jnp.dot(h, w2_ref[...], preferred_element_type=jnp.float32) + b2_ref[...]
    out_ref[...] = jnp.clip(y, -1.0, 1.0).astype(out_ref.dtype)


def fuse_params(wens, bens, w1, b1, w2, b2):
    """Eval-mode fusion of the linear heads with fc1, plus lane-dense f32 packing.

    Valid because dropout is identity in eval and there is no nonlinearity between
    the concatenated head outputs and fc1.  Weights stay f32 (single precision
    source of truth); only layouts are padded to the 128-lane axis.
    """
    f32 = jnp.float32
    wens, bens = wens.astype(f32), bens.astype(f32)
    w1, b1, w2, b2 = w1.astype(f32), b1.astype(f32), w2.astype(f32), b2.astype(f32)

    w_fused = wens @ w1                              # (D, 8)
    b_fused = bens @ w1 + b1                         # (1, 8)
    D, H1 = w_fused.shape
    out_dim = w2.shape[1]
    assert H1 <= LANE and out_dim <= LANE

    wf_p = jnp.zeros((D, LANE), f32).at[:, :H1].set(w_fused)
    bf_p = jnp.zeros((1, LANE), f32).at[:, :H1].set(b_fused)
    w2_p = jnp.zeros((LANE, LANE), f32).at[:H1, :out_dim].set(w2)
    b2_p = jnp.zeros((1, LANE), f32).at[:, :out_dim].set(b2)
    return wf_p, bf_p, w2_p, b2_p


def _round_up(a, m):
    return ((a + m - 1) // m) * m


def _vmem_budget_bytes():
    """~3/4 of physical VMEM: ~96 MiB on v5e/v6e, ~48 MiB on v7x (64 MiB fallback)."""
    try:
        cap = int(pltpu.get_tpu_info().vmem_capacity_bytes)
    except Exception:
        cap = 64 * 1024 * 1024  # conservative (v7x-sized) fallback
    return (cap * 3) // 4


def ensemble_forward(x_nchw, wf_p, bf_p, w2_p, b2_p, *, block_m=512):
    B = x_nchw.shape[0]
    D = wf_p.shape[0]
    flat = math.prod(x_nchw.shape[1:])
    assert flat == D, f"C*H*W={flat} must equal fused in_features={D}"

    # Same element order as torch .view(B, -1); NO dtype cast here (the kernel
    # streams x in its native f32 so we don't pay an extra HBM round-trip).
    x_flat = x_nchw.reshape(B, D)
    if x_flat.dtype != jnp.float32:
        x_flat = x_flat.astype(jnp.float32)
    x_itemsize = 4
    out_itemsize = 2  # bf16 output slab

    # --- VMEM-aware batch-tile selection -------------------------------------
    budget = _vmem_budget_bytes()
    # Resident weights/biases (double-buffered by the default pipeline).
    resident = 2 * 4 * (wf_p.size + bf_p.size + w2_p.size + b2_p.size)
    # Streaming bytes per batch row (double-buffered x tile + bf16 out tile).
    per_row = 2 * (D * x_itemsize + LANE * out_itemsize)
    avail = max(budget - resident, 8 * per_row)
    # TODO(synk): for very large D (x double-buffer or (D,128) weight not fitting
    # the budget) add a second "arbitrary" grid axis tiling D with an f32
    # accumulator scratch instead of shrinking tm further.

    if B <= 8:
        tm = B                                   # single full-extent block
    else:
        tm = min(block_m, _round_up(pl.cdiv(B, 2), 8))   # >=2 blocks -> both v7x TCs
        tm_fit = max(8, (avail // per_row) // 8 * 8)     # fit double-buffers in VMEM
        tm = max(8, min(tm, tm_fit, _round_up(B, 8)))

    grid = (pl.cdiv(B, tm),)

    cost = pl.CostEstimate(
        flops=2 * B * D * LANE + 2 * B * LANE * LANE,
        transcendentals=0,
        bytes_accessed=(x_flat.size * x_itemsize
                        + 4 * (wf_p.size + bf_p.size + w2_p.size + b2_p.size)
                        + B * LANE * out_itemsize),
    )

    out_padded = pl.pallas_call(
        ensemble_kernel,
        out_shape=jax.ShapeDtypeStruct((B, LANE), jnp.bfloat16),
        grid_spec=pltpu.PrefetchScalarGridSpec(
            num_scalar_prefetch=0,
            grid=grid,
            in_specs=[
                pl.BlockSpec((tm, D), lambda i: (i, 0)),        # x: streamed per batch tile
                pl.BlockSpec((D, LANE), lambda i: (0, 0)),      # fused weight: resident
                pl.BlockSpec((1, LANE), lambda i: (0, 0)),      # fused bias: resident
                pl.BlockSpec((LANE, LANE), lambda i: (0, 0)),   # fc2 weight (padded): resident
                pl.BlockSpec((1, LANE), lambda i: (0, 0)),      # fc2 bias (padded): resident
            ],
            out_specs=pl.BlockSpec((tm, LANE), lambda i: (i, 0)),
        ),
        compiler_params=pltpu.CompilerParams(
            dimension_semantics=("parallel",),
            vmem_limit_bytes=int(budget),
        ),
        cost_estimate=cost,
    )(x_flat, wf_p, bf_p, w2_p, b2_p)

    # Logits occupy the first two lanes of the lane-dense output slab.
    return out_padded[:, :2].astype(jnp.float32)


def init_params(key, in_features, num_models):
    """Deterministic parameter init (uniform, PyTorch-Linear-like bounds)."""
    ks = jax.random.split(key, 6)
    two_n = 2 * num_models

    def u(k, shape, fan_in):
        bound = 1.0 / jnp.sqrt(jnp.float32(fan_in))
        return jax.random.uniform(k, shape, jnp.float32, -bound, bound)

    # N frozen sub-model linear heads (in_features -> 2), concatenated along dim 1.
    wens = u(ks[0], (in_features, two_n), in_features)
    bens = u(ks[1], (1, two_n), in_features)
    # fc1: Linear(2*N, 8)
    w1 = u(ks[2], (two_n, 8), two_n)
    b1 = u(ks[3], (1, 8), two_n)
    # fc2: Linear(8, 2)
    w2 = u(ks[4], (8, 2), 8)
    b2 = u(ks[5], (1, 2), 8)
    return wens, bens, w1, b1, w2, b2


if __name__ == "__main__":
    key = jax.random.PRNGKey(0)
    kx, kp = jax.random.split(key)

    # Small deterministic input: NCHW, batch=2, channels=4, spatial=16x16.
    B, C, H, W = 2, 4, 16, 16
    num_models = 3
    D = C * H * W

    x = jax.random.normal(kx, (B, C, H, W), dtype=jnp.float32)
    raw = init_params(kp, D, num_models)
    packed = fuse_params(*raw)

    out = ensemble_forward(x, *packed)
    out = jax.block_until_ready(out)

    assert out.shape == (B, 2)
    assert bool(jnp.all(out <= 1.0)) and bool(jnp.all(out >= -1.0))

    # Pure-JAX eval-mode reference of the unfused module graph (f32).
    wens, bens, w1, b1, w2, b2 = raw
    xf = x.reshape(B, D)
    feats = xf @ wens + bens
    h_ref = jnp.maximum(feats @ w1 + b1, 0.0)          # dropout = identity (eval)
    ref = jnp.clip(h_ref @ w2 + b2, -1.0, 1.0)
    assert jnp.allclose(out, ref, atol=2e-2), (out, ref)  # bf16-store + MXU tolerance

    print("KERNEL_OK")
</pallas_src>

<mosaic_0001>
module attributes {stable_mosaic.version = 11 : i64} {
  func.func @ensemble_kernel(%arg0: i32, %arg1: memref<2x1024xf32, #tpu.memory_space<vmem>>, %arg2: memref<1024x128xf32, #tpu.memory_space<vmem>>, %arg3: memref<1x128xf32, #tpu.memory_space<vmem>>, %arg4: memref<128x128xf32, #tpu.memory_space<vmem>>, %arg5: memref<1x128xf32, #tpu.memory_space<vmem>>, %arg6: memref<2x128xbf16, #tpu.memory_space<vmem>>) attributes {dimension_semantics = [#tpu.dimension_semantics<parallel>], iteration_bounds = array<i64: 1>, scalar_prefetch = 0 : i64, scratch_operands = 0 : i64, tpu.core_type = #tpu.core_type<tc>, window_params = [{transform_indices = @transform_0, window_bounds = array<i64: 2, 1024>}, {pipeline_mode = #tpu.pipeline_mode<synchronous>, transform_indices = @transform_1, window_bounds = array<i64: 1024, 128>}, {pipeline_mode = #tpu.pipeline_mode<synchronous>, transform_indices = @transform_2, window_bounds = array<i64: 1, 128>}, {pipeline_mode = #tpu.pipeline_mode<synchronous>, transform_indices = @transform_3, window_bounds = array<i64: 128, 128>}, {pipeline_mode = #tpu.pipeline_mode<synchronous>, transform_indices = @transform_4, window_bounds = array<i64: 1, 128>}, {transform_indices = @transform_5, window_bounds = array<i64: 2, 128>}]} {
    %c0 = arith.constant 0 : index
    %c0_0 = arith.constant 0 : index
    %0 = vector.load %arg1[%c0, %c0_0] : memref<2x1024xf32, #tpu.memory_space<vmem>>, vector<2x1024xf32>
    %c0_1 = arith.constant 0 : index
    %c0_2 = arith.constant 0 : index
    %1 = vector.load %arg2[%c0_1, %c0_2] : memref<1024x128xf32, #tpu.memory_space<vmem>>, vector<1024x128xf32>
    %cst = arith.constant dense<0.000000e+00> : vector<2x128xf32>
    %2 = tpu.matmul %0, %1, %cst {dimension_numbers = #tpu.dot_dimension_numbers<[1], [0], [0], [1], [0, 0, 1, 1], [], []>} : vector<2x1024xf32>, vector<1024x128xf32>, vector<2x128xf32> -> vector<2x128xf32>
    %c0_3 = arith.constant 0 : index
    %c0_4 = arith.constant 0 : index
    %3 = vector.load %arg3[%c0_3, %c0_4] : memref<1x128xf32, #tpu.memory_space<vmem>>, vector<1x128xf32>
    %4 = vector.broadcast %3 : vector<1x128xf32> to vector<2x128xf32>
    %5 = arith.addf %2, %4 : vector<2x128xf32>
    %cst_5 = arith.constant 0.000000e+00 : f32
    %6 = vector.broadcast %cst_5 : f32 to vector<2x128xf32>
    %7 = arith.maximumf %5, %6 : vector<2x128xf32>
    %c0_6 = arith.constant 0 : index
    %c0_7 = arith.constant 0 : index
    %8 = vector.load %arg4[%c0_6, %c0_7] : memref<128x128xf32, #tpu.memory_space<vmem>>, vector<128x128xf32>
    %cst_8 = arith.constant dense<0.000000e+00> : vector<2x128xf32>
    %9 = tpu.matmul %7, %8, %cst_8 {dimension_numbers = #tpu.dot_dimension_numbers<[1], [0], [0], [1], [0, 0, 1, 1], [], []>} : vector<2x128xf32>, vector<128x128xf32>, vector<2x128xf32> -> vector<2x128xf32>
    %c0_9 = arith.constant 0 : index
    %c0_10 = arith.constant 0 : index
    %10 = vector.load %arg5[%c0_9, %c0_10] : memref<1x128xf32, #tpu.memory_space<vmem>>, vector<1x128xf32>
    %11 = vector.broadcast %10 : vector<1x128xf32> to vector<2x128xf32>
    %12 = arith.addf %9, %11 : vector<2x128xf32>
    %cst_11 = arith.constant -1.000000e+00 : f32
    %cst_12 = arith.constant 1.000000e+00 : f32
    %13 = vector.broadcast %cst_11 : f32 to vector<2x128xf32>
    %14 = arith.maximumf %13, %12 : vector<2x128xf32>
    %15 = vector.broadcast %cst_12 : f32 to vector<2x128xf32>
    %16 = arith.minimumf %15, %14 : vector<2x128xf32>
    %17 = arith.truncf %16 : vector<2x128xf32> to vector<2x128xbf16>
    %c0_13 = arith.constant 0 : index
    %c0_14 = arith.constant 0 : index
    %18 = vector.load %arg6[%c0_13, %c0_14] : memref<2x128xbf16, #tpu.memory_space<vmem>>, vector<2x128xbf16>
    tpu.vector_store %arg6[%c0_13, %c0_14], %17 {strides = array<i32>} : memref<2x128xbf16, #tpu.memory_space<vmem>>, vector<2x128xbf16>,
    return
  }
  func.func @transform_0(%arg0: i32) -> (i32, i32) {
    %c0_i32 = arith.constant 0 : i32
    %c0_i32_0 = arith.constant 0 : i32
    return %arg0, %c0_i32 : i32, i32
  }
  func.func @transform_1(%arg0: i32) -> (i32, i32) {
    %c0_i32 = arith.constant 0 : i32
    %c0_i32_0 = arith.constant 0 : i32
    %c0_i32_1 = arith.constant 0 : i32
    return %c0_i32, %c0_i32_0 : i32, i32
  }
  func.func @transform_2(%arg0: i32) -> (i32, i32) {
    %c0_i32 = arith.constant 0 : i32
    %c0_i32_0 = arith.constant 0 : i32
    %c0_i32_1 = arith.constant 0 : i32
    return %c0_i32, %c0_i32_0 : i32, i32
  }
  func.func @transform_3(%arg0: i32) -> (i32, i32) {
    %c0_i32 = arith.constant 0 : i32
    %c0_i32_0 = arith.constant 0 : i32
    %c0_i32_1 = arith.constant 0 : i32
    return %c0_i32, %c0_i32_0 : i32, i32
  }
  func.func @transform_4(%arg0: i32) -> (i32, i32) {
    %c0_i32 = arith.constant 0 : i32
    %c0_i32_0 = arith.constant 0 : i32
    %c0_i32_1 = arith.constant 0 : i32
    return %c0_i32, %c0_i32_0 : i32, i32
  }
  func.func @transform_5(%arg0: i32) -> (i32, i32) {
    %c0_i32 = arith.constant 0 : i32
    %c0_i32_0 = arith.constant 0 : i32
    return %arg0, %c0_i32 : i32, i32
  }
}

</mosaic_0001>

<bundles_post_ra>
// kernel: tpu_custom_call.1
= control target key start
LH: loop header
LB: loop body
LE: loop exit
PB: predicated region body
PF: predicated region fallthrough
CT: control target
= control target key end

     0   :  { %10 = vsyncpa [#allocation3], 0  ;;  %s609_s0 = inlined_call_operand.hbm [shape: f32[2,1024], index: 0, kind: input, shape index: {}]   ;;  %s610_s1 = inlined_call_operand.hbm [shape: f32[1024,128], index: 1, kind: input, shape index: {}]   ;;  %s611_s2 = inlined_call_operand.vmem [shape: f32[1,128], index: 2, kind: input, shape index: {}]   ;;  %s612_s3 = inlined_call_operand.hbm [shape: f32[128,128], index: 3, kind: input, shape index: {}]   ;;  %s613_s4 = inlined_call_operand.vmem [shape: f32[1,128], index: 4, kind: input, shape index: {}]   ;;  %s614_s5 = inlined_call_operand.hbm [shape: bf16[2,128], index: 5, kind: output, shape index: {}]  }
   0x1   :  { %11 = vsyncpa [#allocation6], 0  ;;  %s28_s20 = sshll.u32 %s610_s1, 4  ;;  %s29_s20 = int_to_ptr.hbm [resolvable:$true] %s28_s20 }
   0x2   :  { %12 = vsyncpa [#allocation4], 0  ;;  %s555_s21 = smov [#allocation5]   ;;  %s18_s25 = sshll.u32 %s609_s0, 4  ;;  %s19_s25 = int_to_ptr.hbm [resolvable:$true] %s18_s25 }
   0x3   :  { %s30_s22 = sshll.u32 %s555_s21, 4  ;;  %s556_s26 = smov 128   ;;  %s31_s22 = int_to_ptr.vmem [resolvable:$true] %s30_s22 }
   0x4   :  { %s557_s27 = smov 8   ;;  %s558_s28 = smov [#allocation2]  }
   0x5   :  { %36 = dma.hbm_to_vmem [thread:$0]  %s29_s20, 16384, %s31_s22, [#allocation6], %s556_s26, %s556_s26, %s557_s27  }
   0x6   :  { %s20_s29 = sshll.u32 %s558_s28, 4  ;;  %s43_s7 = sshll.u32 %s612_s3, 4  ;;  %s21_s29 = int_to_ptr.vmem [resolvable:$true] %s20_s29  ;;  %s44_s7 = int_to_ptr.hbm [resolvable:$true] %s43_s7 }
   0x7   :  { %23 = dma.hbm_to_vmem [thread:$0]  %s19_s25, 256, %s21_s29, [#allocation3]  }
   0x8   :  { %s559_s1 = smov [#allocation7]  }
   0x9   :  { %s45_s8 = sshll.u32 %s559_s1, 4  ;;  %s46_s8 = int_to_ptr.vmem [resolvable:$true] %s45_s8 }
   0xa   :  { %51 = dma.hbm_to_vmem [thread:$0]  %s44_s7, 2048, %s46_s8, [#allocation6], %s556_s26, %s556_s26, %s557_s27  }
   0xb   :  { %549 = dma.done.wait [#allocation3], 256  }
   0xc   :  { %550 = vsyncadd [#allocation3], 4294967040 }
   0xd   :  { %551 = dma.done.wait [#allocation6], 18432  }
   0xe   :  { %552 = vsyncadd [#allocation6], 4294948864  ;;  %v115_v0 = vld [vmem:[#allocation5 + $0x178] sm:$0xff]  ;;  %v114_v2 = vld [vmem:[#allocation5 + $0x170] sm:$0xff]  ;;  %s560_s10 = smov [#allocation8]   ;;  %s433_s14 = sshll.u32 %s614_s5, 4  ;;  %s434_s14 = int_to_ptr.hbm [resolvable:$true] %s433_s14 }
   0xf   :  { %v83_v1 = vld [vmem:[#allocation5 + $0x78] sm:$0xff]  ;;  %261 = vmatpush.msra.mxu2 %v115_v0  ;;  %v82_v4 = vld [vmem:[#allocation5 + $0x70] sm:$0xff]  ;;  %v113_v6 = vld [vmem:[#allocation5 + $0x168] sm:$0xff]  ;;  %s431_s11 = sshll.u32 %s560_s10, 4  ;;  %s432_s11 = int_to_ptr.vmem [resolvable:$true] %s431_s11 }
  0x10   :  { %221 = vmatpush.msra.mxu0 %v83_v1  ;;  %v131_v3 = vld [vmem:[#allocation5 + $0x1f8] sm:$0xff]  ;;  %v130_v7 = vld [vmem:[#allocation5 + $0x1f0] sm:$0xff]  ;;  %v81_v8 = vld [vmem:[#allocation5 + $0x68] sm:$0xff] }
  0x11   :  { %v99_v5 = vld [vmem:[#allocation5 + $0xf8] sm:$0xff]  ;;  %281 = vmatpush.msra.mxu3 %v131_v3  ;;  %262 = vmatpush.msra.mxu2 %v114_v2  ;;  %v98_v9 = vld [vmem:[#allocation5 + $0xf0] sm:$0xff]  ;;  %v129_v10 = vld [vmem:[#allocation5 + $0x1e8] sm:$0xff] }
  0x12   :  { %241 = vmatpush.msra.mxu1 %v99_v5  ;;  %222 = vmatpush.msra.mxu0 %v82_v4  ;;  %v112_v11 = vld [vmem:[#allocation5 + $0x160] sm:$0xff]  ;;  %v97_v13 = vld [vmem:[#allocation5 + $0xe8] sm:$0xff]  ;;  %v111_v16 = vld [vmem:[#allocation5 + $0x158] sm:$0xff] }
  0x13   :  { %282 = vmatpush.msra.mxu3 %v130_v7  ;;  %v80_v12 = vld [vmem:[#allocation5 + $0x60] sm:$0xff]  ;;  %263 = vmatpush.msra.mxu2 %v113_v6  ;;  %v79_v17 = vld [vmem:[#allocation5 + $0x58] sm:$0xff]  ;;  %v110_v20 = vld [vmem:[#allocation5 + $0x150] sm:$0xff] }
  0x14   :  { %242 = vmatpush.msra.mxu1 %v98_v9  ;;  %223 = vmatpush.msra.mxu0 %v81_v8  ;;  %v128_v14 = vld [vmem:[#allocation5 + $0x1e0] sm:$0xff]  ;;  %v127_v18 = vld [vmem:[#allocation5 + $0x1d8] sm:$0xff]  ;;  %v78_v21 = vld [vmem:[#allocation5 + $0x50] sm:$0xff] }
  0x15   :  { %v96_v15 = vld [vmem:[#allocation5 + $0xe0] sm:$0xff]  ;;  %283 = vmatpush.msra.mxu3 %v129_v10  ;;  %264 = vmatpush.msra.mxu2 %v112_v11  ;;  %v95_v19 = vld [vmem:[#allocation5 + $0xd8] sm:$0xff]  ;;  %v126_v22 = vld [vmem:[#allocation5 + $0x1d0] sm:$0xff] }
  0x16   :  { %243 = vmatpush.msra.mxu1 %v97_v13  ;;  %224 = vmatpush.msra.mxu0 %v80_v12  ;;  %v94_v23 = vld [vmem:[#allocation5 + $0xd0] sm:$0xff]  ;;  %v109_v24 = vld [vmem:[#allocation5 + $0x148] sm:$0xff]  ;;  %v108_v28 = vld [vmem:[#allocation5 + $0x140] sm:$0xff] }
  0x17   :  { %284 = vmatpush.msra.mxu3 %v128_v14  ;;  %265 = vmatpush.msra.mxu2 %v111_v16  ;;  %v77_v25 = vld [vmem:[#allocation5 + $0x48] sm:$0xff]  ;;  %v76_v29 = vld [vmem:[#allocation5 + $0x40] sm:$0xff]  ;;  %v107_v32 = vld [vmem:[#allocation5 + $0x138] sm:$0xff] }
  0x18   :  { %244 = vmatpush.msra.mxu1 %v96_v15  ;;  %225 = vmatpush.msra.mxu0 %v79_v17  ;;  %v125_v26 = vld [vmem:[#allocation5 + $0x1c8] sm:$0xff]  ;;  %v124_v30 = vld [vmem:[#allocation5 + $0x1c0] sm:$0xff]  ;;  %v75_v33 = vld [vmem:[#allocation5 + $0x38] sm:$0xff] }
  0x19   :  { %285 = vmatpush.msra.mxu3 %v127_v18  ;;  %266 = vmatpush.msra.mxu2 %v110_v20  ;;  %v93_v27 = vld [vmem:[#allocation5 + $0xc8] sm:$0xff]  ;;  %v92_v31 = vld [vmem:[#allocation5 + $0xc0] sm:$0xff]  ;;  %v123_v34 = vld [vmem:[#allocation5 + $0x1b8] sm:$0xff] }
  0x1a   :  { %245 = vmatpush.msra.mxu1 %v95_v19  ;;  %226 = vmatpush.msra.mxu0 %v78_v21  ;;  %v91_v35 = vld [vmem:[#allocation5 + $0xb8] sm:$0xff]  ;;  %v106_v36 = vld [vmem:[#allocation5 + $0x130] sm:$0xff]  ;;  %v105_v40 = vld [vmem:[#allocation5 + $0x128] sm:$0xff] }
  0x1b   :  { %286 = vmatpush.msra.mxu3 %v126_v22  ;;  %267 = vmatpush.msra.mxu2 %v109_v24  ;;  %v74_v37 = vld [vmem:[#allocation5 + $0x30] sm:$0xff]  ;;  %v73_v41 = vld [vmem:[#allocation5 + $0x28] sm:$0xff]  ;;  %v104_v44 = vld [vmem:[#allocation5 + $0x120] sm:$0xff] }
  0x1c   :  { %246 = vmatpush.msra.mxu1 %v94_v23  ;;  %227 = vmatpush.msra.mxu0 %v77_v25  ;;  %v122_v38 = vld [vmem:[#allocation5 + $0x1b0] sm:$0xff]  ;;  %v121_v42 = vld [vmem:[#allocation5 + $0x1a8] sm:$0xff]  ;;  %v72_v45 = vld [vmem:[#allocation5 + $0x20] sm:$0xff] }
  0x1d   :  { %287 = vmatpush.msra.mxu3 %v125_v26  ;;  %268 = vmatpush.msra.mxu2 %v108_v28  ;;  %v90_v39 = vld [vmem:[#allocation5 + $0xb0] sm:$0xff]  ;;  %v89_v43 = vld [vmem:[#allocation5 + $0xa8] sm:$0xff]  ;;  %v120_v46 = vld [vmem:[#allocation5 + $0x1a0] sm:$0xff] }
  0x1e   :  { %247 = vmatpush.msra.mxu1 %v93_v27  ;;  %228 = vmatpush.msra.mxu0 %v76_v29  ;;  %v88_v47 = vld [vmem:[#allocation5 + $0xa0] sm:$0xff]  ;;  %v103_v48 = vld [vmem:[#allocation5 + $0x118] sm:$0xff]  ;;  %v102_v52 = vld [vmem:[#allocation5 + $0x110] sm:$0xff] }
  0x1f   :  { %288 = vmatpush.msra.mxu3 %v124_v30  ;;  %269 = vmatpush.msra.mxu2 %v107_v32  ;;  %v71_v49 = vld [vmem:[#allocation5 + $0x18] sm:$0xff]  ;;  %v70_v53 = vld [vmem:[#allocation5 + $0x10] sm:$0xff]  ;;  %v101_v56 = vld [vmem:[#allocation5 + $0x108] sm:$0xff] }
  0x20   :  { %248 = vmatpush.msra.mxu1 %v92_v31  ;;  %229 = vmatpush.msra.mxu0 %v75_v33  ;;  %v119_v50 = vld [vmem:[#allocation5 + $0x198] sm:$0xff]  ;;  %v118_v54 = vld [vmem:[#allocation5 + $0x190] sm:$0xff]  ;;  %v69_v57 = vld [vmem:[#allocation5 + $0x8] sm:$0xff] }
  0x21   :  { %289 = vmatpush.msra.mxu3 %v123_v34  ;;  %270 = vmatpush.msra.mxu2 %v106_v36  ;;  %v87_v51 = vld [vmem:[#allocation5 + $0x98] sm:$0xff]  ;;  %v86_v55 = vld [vmem:[#allocation5 + $0x90] sm:$0xff]  ;;  %v117_v58 = vld [vmem:[#allocation5 + $0x188] sm:$0xff] }
  0x22   :  { %249 = vmatpush.msra.mxu1 %v91_v35  ;;  %230 = vmatpush.msra.mxu0 %v74_v37  ;;  %v85_v59 = vld [vmem:[#allocation5 + $0x88] sm:$0xff]  ;;  %v100_v60 = vld [vmem:[#allocation5 + $0x100] sm:$0xff]  ;;  %v179_v62 = vld [vmem:[#allocation5 + $0x378] sm:$0xff] }
  0x23   :  { %290 = vmatpush.msra.mxu3 %v122_v38  ;;  %271 = vmatpush.msra.mxu2 %v105_v40  ;;  %v68_v61 = vld [vmem:[#allocation5] sm:$0xff]  ;;  %v147_v0 = vld [vmem:[#allocation5 + $0x278] sm:$0xff]  ;;  %v178_v2 = vld [vmem:[#allocation5 + $0x370] sm:$0xff] }
  0x24   :  { %250 = vmatpush.msra.mxu1 %v90_v39  ;;  %231 = vmatpush.msra.mxu0 %v73_v41  ;;  %v116_v63 = vld [vmem:[#allocation5 + $0x180] sm:$0xff]  ;;  %v195_v1 = vld [vmem:[#allocation5 + $0x3f8] sm:$0xff]  ;;  %v146_v4 = vld [vmem:[#allocation5 + $0x270] sm:$0xff] }
  0x25   :  { %291 = vmatpush.msra.mxu3 %v121_v42  ;;  %272 = vmatpush.msra.mxu2 %v104_v44  ;;  %v84_v3 = vld [vmem:[#allocation5 + $0x80] sm:$0xff]  ;;  %v163_v5 = vld [vmem:[#allocation5 + $0x2f8] sm:$0xff]  ;;  %v177_v6 = vld [vmem:[#allocation5 + $0x368] sm:$0xff] }
  0x26   :  { %251 = vmatpush.msra.mxu1 %v89_v43  ;;  %232 = vmatpush.msra.mxu0 %v72_v45  ;;  %v194_v7 = vld [vmem:[#allocation5 + $0x3f0] sm:$0xff]  ;;  %v145_v8 = vld [vmem:[#allocation5 + $0x268] sm:$0xff]  ;;  %v176_v10 = vld [vmem:[#allocation5 + $0x360] sm:$0xff] }
  0x27   :  { %292 = vmatpush.msra.mxu3 %v120_v46  ;;  %273 = vmatpush.msra.mxu2 %v103_v48  ;;  %v162_v9 = vld [vmem:[#allocation5 + $0x2f0] sm:$0xff]  ;;  %v193_v11 = vld [vmem:[#allocation5 + $0x3e8] sm:$0xff]  ;;  %v144_v12 = vld [vmem:[#allocation5 + $0x260] sm:$0xff] }
  0x28   :  { %252 = vmatpush.msra.mxu1 %v88_v47  ;;  %233 = vmatpush.msra.mxu0 %v71_v49  ;;  %v161_v13 = vld [vmem:[#allocation5 + $0x2e8] sm:$0xff]  ;;  %v66_v14 = vld [vmem:[#allocation2] sm:$0xff]  ;;  %v175_v15 = vld [vmem:[#allocation5 + $0x358] sm:$0xff] }
  0x29   :  { %293 = vmatpush.msra.mxu3 %v119_v50  ;;  %274 = vmatpush.msra.mxu2 %v102_v52  ;;  %v192_v16 = vld [vmem:[#allocation5 + $0x3e0] sm:$0xff]  ;;  %202 = vst [vmem:[#allocation1] ss:$4 sm:$0xff] %v66_v14  ;;  %v143_v17 = vld [vmem:[#allocation5 + $0x258] sm:$0xff]  ;;  %v174_v19 = vld [vmem:[#allocation5 + $0x350] sm:$0xff] }
  0x2a   :  { %253 = vmatpush.msra.mxu1 %v87_v51  ;;  %234 = vmatpush.msra.mxu0 %v70_v53  ;;  %v160_v18 = vld [vmem:[#allocation5 + $0x2e0] sm:$0xff]  ;;  %v191_v20 = vld [vmem:[#allocation5 + $0x3d8] sm:$0xff]  ;;  %v142_v21 = vld [vmem:[#allocation5 + $0x250] sm:$0xff] }
  0x2b   :  { %294 = vmatpush.msra.mxu3 %v118_v54  ;;  %275 = vmatpush.msra.mxu2 %v101_v56  ;;  %v159_v22 = vld [vmem:[#allocation5 + $0x2d8] sm:$0xff]  ;;  %v173_v23 = vld [vmem:[#allocation5 + $0x348] sm:$0xff]  ;;  %v190_v24 = vld [vmem:[#allocation5 + $0x3d0] sm:$0xff] }
  0x2c   :  { %254 = vmatpush.msra.mxu1 %v86_v55  ;;  %235 = vmatpush.msra.mxu0 %v69_v57  ;;  %v67_v25 = vld [vmem:[#allocation2 + $0x8] sm:$0xff]  ;;  %v141_v26 = vld [vmem:[#allocation5 + $0x248] sm:$0xff]  ;;  %v158_v27 = vld [vmem:[#allocation5 + $0x2d0] sm:$0xff] }
  0x2d   :  { %295 = vmatpush.msra.mxu3 %v117_v58  ;;  %276 = vmatpush.msra.mxu2 %v100_v60  ;;  %204 = vst [vmem:[#allocation1 + $0x20] ss:$4 sm:$0xff] %v67_v25  ;;  %v172_v28 = vld [vmem:[#allocation5 + $0x340] sm:$0xff]  ;;  %v189_v29 = vld [vmem:[#allocation5 + $0x3c8] sm:$0xff]  ;;  %v171_v32 = vld [vmem:[#allocation5 + $0x338] sm:$0xff] }
  0x2e   :  { %255 = vmatpush.msra.mxu1 %v85_v59  ;;  %236 = vmatpush.msra.mxu0 %v68_v61  ;;  %v140_v30 = vld [vmem:[#allocation5 + $0x240] sm:$0xff]  ;;  %v157_v31 = vld [vmem:[#allocation5 + $0x2c8] sm:$0xff]  ;;  %v139_v34 = vld [vmem:[#allocation5 + $0x238] sm:$0xff] }
  0x2f   :  { %341 = vmatpush.msrb.mxu2 %v179_v62  ;;  %296 = vmatpush.msra.mxu3 %v116_v63  ;;  %v188_v33 = vld [vmem:[#allocation5 + $0x3c0] sm:$0xff]  ;;  %v170_v36 = vld [vmem:[#allocation5 + $0x330] sm:$0xff]  ;;  %v187_v37 = vld [vmem:[#allocation5 + $0x3b8] sm:$0xff] }
  0x30   :  { %301 = vmatpush.msrb.mxu0 %v147_v0  ;;  %256 = vmatpush.msra.mxu1 %v84_v3  ;;  %v156_v35 = vld [vmem:[#allocation5 + $0x2c0] sm:$0xff]  ;;  %v138_v38 = vld [vmem:[#allocation5 + $0x230] sm:$0xff]  ;;  %v155_v39 = vld [vmem:[#allocation5 + $0x2b8] sm:$0xff] }
  0x31   :  { %361 = vmatpush.msrb.mxu3 %v195_v1  ;;  %342 = vmatpush.msrb.mxu2 %v178_v2  ;;  %v169_v40 = vld [vmem:[#allocation5 + $0x328] sm:$0xff]  ;;  %v186_v41 = vld [vmem:[#allocation5 + $0x3b0] sm:$0xff]  ;;  %v168_v44 = vld [vmem:[#allocation5 + $0x320] sm:$0xff] }
  0x32   :  { %302 = vmatpush.msrb.mxu0 %v146_v4  ;;  %321 = vmatpush.msrb.mxu1 %v163_v5  ;;  %v137_v42 = vld [vmem:[#allocation5 + $0x228] sm:$0xff]  ;;  %v154_v43 = vld [vmem:[#allocation5 + $0x2b0] sm:$0xff]  ;;  %v207_v46 = vld.sshfl [vmem:[#allocation1 + $0x10] sm:$0xff pattern:$0x73625140] }
  0x33   :  { %343 = vmatpush.msrb.mxu2 %v177_v6  ;;  %362 = vmatpush.msrb.mxu3 %v194_v7  ;;  %v185_v45 = vld [vmem:[#allocation5 + $0x3a8] sm:$0xff]  ;;  %v136_v47 = vld [vmem:[#allocation5 + $0x220] sm:$0xff]  ;;  %v167_v49 = vld [vmem:[#allocation5 + $0x318] sm:$0xff] }
  0x34   :  { %303 = vmatpush.msrb.mxu0 %v145_v8  ;;  %322 = vmatpush.msrb.mxu1 %v162_v9  ;;  %v153_v48 = vld [vmem:[#allocation5 + $0x2a8] sm:$0xff]  ;;  %v184_v50 = vld [vmem:[#allocation5 + $0x3a0] sm:$0xff]  ;;  %v135_v53 = vld [vmem:[#allocation5 + $0x218] sm:$0xff] }
  0x35   :  { %344 = vmatpush.msrb.mxu2 %v176_v10  ;;  %363 = vmatpush.msrb.mxu3 %v193_v11  ;;  %v205_v51 = vld.sshfl [vmem:[#allocation1] sm:$0xff pattern:$0x73625140]  ;;  %v208_v52 = vld.sshfl [vmem:[#allocation1 + $0x18] sm:$0xff pattern:$0x73625140] }
  0x36   :  { %304 = vmatpush.msrb.mxu0 %v144_v12  ;;  %323 = vmatpush.msrb.mxu1 %v161_v13  ;;  %v152_v54 = vld [vmem:[#allocation5 + $0x2a0] sm:$0xff]  ;;  %v166_v55 = vld [vmem:[#allocation5 + $0x310] sm:$0xff]  ;;  %v183_v56 = vld [vmem:[#allocation5 + $0x398] sm:$0xff] }
  0x37   :  { %345 = vmatpush.msrb.mxu2 %v175_v15  ;;  %364 = vmatpush.msrb.mxu3 %v192_v16  ;;  %v206_v57 = vld.sshfl [vmem:[#allocation1 + $0x8] sm:$0xff pattern:$0x73625140]  ;;  %v151_v59 = vld [vmem:[#allocation5 + $0x298] sm:$0xff]  ;;  %v165_v60 = vld [vmem:[#allocation5 + $0x308] sm:$0xff] }
  0x38   :  { %305 = vmatpush.msrb.mxu0 %v143_v17  ;;  %324 = vmatpush.msrb.mxu1 %v160_v18  ;;  %v134_v58 = vld [vmem:[#allocation5 + $0x210] sm:$0xff]  ;;  %v133_v62 = vld [vmem:[#allocation5 + $0x208] sm:$0xff]  ;;  %v164_v0 = vld [vmem:[#allocation5 + $0x300] sm:$0xff] }
  0x39   :  { %346 = vmatpush.msrb.mxu2 %v174_v19  ;;  %365 = vmatpush.msrb.mxu3 %v191_v20  ;;  %v182_v61 = vld [vmem:[#allocation5 + $0x390] sm:$0xff]  ;;  %v181_v1 = vld [vmem:[#allocation5 + $0x388] sm:$0xff]  ;;  %v211_v2 = vld.sshfl [vmem:[#allocation1 + $0x30] sm:$0xff pattern:$0x73625140] }
  0x3a   :  { %306 = vmatpush.msrb.mxu0 %v142_v21  ;;  %325 = vmatpush.msrb.mxu1 %v159_v22  ;;  %v150_v63 = vld [vmem:[#allocation5 + $0x290] sm:$0xff]  ;;  %v132_v3 = vld [vmem:[#allocation5 + $0x200] sm:$0xff]  ;;  %v149_v4 = vld [vmem:[#allocation5 + $0x288] sm:$0xff] }
  0x3b   :  { %347 = vmatpush.msrb.mxu2 %v173_v23  ;;  %366 = vmatpush.msrb.mxu3 %v190_v24  ;;  %v180_v5 = vld [vmem:[#allocation5 + $0x380] sm:$0xff]  ;;  %v209_v6 = vld.sshfl [vmem:[#allocation1 + $0x20] sm:$0xff pattern:$0x73625140]  ;;  %v397_v9 = vld [vmem:[#allocation7 + $0x78] sm:$0xff] }
  0x3c   :  { %307 = vmatpush.msrb.mxu0 %v141_v26  ;;  %326 = vmatpush.msrb.mxu1 %v158_v27  ;;  %v212_v7 = vld.sshfl [vmem:[#allocation1 + $0x38] sm:$0xff pattern:$0x73625140]  ;;  %v210_v10 = vld.sshfl [vmem:[#allocation1 + $0x28] sm:$0xff pattern:$0x73625140] }
  0x3d   :  { %348 = vmatpush.msrb.mxu2 %v172_v28  ;;  %367 = vmatpush.msrb.mxu3 %v189_v29  ;;  %v148_v8 = vld [vmem:[#allocation5 + $0x280] sm:$0xff]  ;;  %v396_v11 = vld [vmem:[#allocation7 + $0x70] sm:$0xff]  ;;  %v395_v12 = vld [vmem:[#allocation7 + $0x68] sm:$0xff] }
  0x3e   :  { %308 = vmatpush.msrb.mxu0 %v140_v30  ;;  %327 = vmatpush.msrb.mxu1 %v157_v31  ;;  %v394_v13 = vld [vmem:[#allocation7 + $0x60] sm:$0xff]  ;;  %v393_v14 = vld [vmem:[#allocation7 + $0x58] sm:$0xff]  ;;  %v392_v15 = vld [vmem:[#allocation7 + $0x50] sm:$0xff] }
  0x3f   :  { %349 = vmatpush.msrb.mxu2 %v171_v32  ;;  %368 = vmatpush.msrb.mxu3 %v188_v33  ;;  %v391_v16 = vld [vmem:[#allocation7 + $0x48] sm:$0xff]  ;;  %v390_v17 = vld [vmem:[#allocation7 + $0x40] sm:$0xff]  ;;  %v389_v18 = vld [vmem:[#allocation7 + $0x38] sm:$0xff] }
  0x40   :  { %309 = vmatpush.msrb.mxu0 %v139_v34  ;;  %328 = vmatpush.msrb.mxu1 %v156_v35  ;;  %v388_v19 = vld [vmem:[#allocation7 + $0x30] sm:$0xff]  ;;  %v387_v20 = vld [vmem:[#allocation7 + $0x28] sm:$0xff]  ;;  %v386_v21 = vld [vmem:[#allocation7 + $0x20] sm:$0xff] }
  0x41   :  { %350 = vmatpush.msrb.mxu2 %v170_v36  ;;  %369 = vmatpush.msrb.mxu3 %v187_v37  ;;  %v385_v22 = vld [vmem:[#allocation7 + $0x18] sm:$0xff]  ;;  %v384_v23 = vld [vmem:[#allocation7 + $0x10] sm:$0xff]  ;;  %v383_v24 = vld [vmem:[#allocation7 + $0x8] sm:$0xff] }
  0x42   :  { %310 = vmatpush.msrb.mxu0 %v138_v38  ;;  %329 = vmatpush.msrb.mxu1 %v155_v39  ;;  %v382_v25 = vld [vmem:[#allocation7] sm:$0xff]  ;;  %v451_v26 = vld [vmem:[%s611_s2] ss:$0 sm:$0xff] }
  0x43   :  { %351 = vmatpush.msrb.mxu2 %v169_v40  ;;  %370 = vmatpush.msrb.mxu3 %v186_v41 }
  0x44   :  { %311 = vmatpush.msrb.mxu0 %v137_v42  ;;  %330 = vmatpush.msrb.mxu1 %v154_v43 }
  0x45   :  { %352 = vmatpush.msrb.mxu2 %v168_v44  ;;  %371 = vmatpush.msrb.mxu3 %v185_v45  ;;  %v452_v44 = vld [vmem:[%s613_s4] ss:$0 sm:$0xff] }
  0x46   :  { %277 = vmatmul.f32.vlgmr.msra.gmra.mxu2 %v207_v46  ;;  %312 = vmatpush.msrb.mxu0 %v136_v47 }
  0x47   :  { %331 = vmatpush.msrb.mxu1 %v153_v48  ;;  %353 = vmatpush.msrb.mxu2 %v167_v49 }
  0x48   :  { %372 = vmatpush.msrb.mxu3 %v184_v50  ;;  %237 = vmatmul.f32.vlgmr.msra.gmra.mxu0 %v205_v51 }
  0x49   :  { %297 = vmatmul.f32.vlgmr.msra.gmra.mxu3 %v208_v52  ;;  %313 = vmatpush.msrb.mxu0 %v135_v53 }
  0x4a   :  { %332 = vmatpush.msrb.mxu1 %v152_v54  ;;  %354 = vmatpush.msrb.mxu2 %v166_v55 }
  0x4b   :  { %373 = vmatpush.msrb.mxu3 %v183_v56  ;;  %257 = vmatmul.f32.vlgmr.msra.gmra.mxu1 %v206_v57 }
  0x4c   :  { %314 = vmatpush.msrb.mxu0 %v134_v58  ;;  %333 = vmatpush.msrb.mxu1 %v151_v59 }
  0x4d   :  { %355 = vmatpush.msrb.mxu2 %v165_v60  ;;  %374 = vmatpush.msrb.mxu3 %v182_v61 }
  0x4e   :  { %315 = vmatpush.msrb.mxu0 %v133_v62  ;;  %334 = vmatpush.msrb.mxu1 %v150_v63 }
  0x4f   :  { %356 = vmatpush.msrb.mxu2 %v164_v0  ;;  %375 = vmatpush.msrb.mxu3 %v181_v1 }
  0x50   :  { %357 = vmatmul.f32.vlgmr.msrb.gmra.mxu2 %v211_v2  ;;  %316 = vmatpush.msrb.mxu0 %v132_v3 }
  0x51   :  { %335 = vmatpush.msrb.mxu1 %v149_v4  ;;  %376 = vmatpush.msrb.mxu3 %v180_v5 }
  0x52   :  { %317 = vmatmul.f32.vlgmr.msrb.gmra.mxu0 %v209_v6  ;;  %377 = vmatmul.f32.vlgmr.msrb.gmra.mxu3 %v212_v7 }
  0x53   :  { %336 = vmatpush.msrb.mxu1 %v148_v8  ;;  %402 = vmatpush.msra.mxu0 %v397_v9 }
  0x54   :  { %337 = vmatmul.f32.vlgmr.msrb.gmra.mxu1 %v210_v10 }
  0x55   :  { %403 = vmatpush.msra.mxu0 %v396_v11 }
  0x57   :  { %404 = vmatpush.msra.mxu0 %v395_v12 }
  0x59   :  { %405 = vmatpush.msra.mxu0 %v394_v13 }
  0x5b   :  { %406 = vmatpush.msra.mxu0 %v393_v14 }
  0x5d   :  { %407 = vmatpush.msra.mxu0 %v392_v15 }
  0x5f   :  { %408 = vmatpush.msra.mxu0 %v391_v16 }
  0x61   :  { %409 = vmatpush.msra.mxu0 %v390_v17 }
  0x63   :  { %410 = vmatpush.msra.mxu0 %v389_v18 }
  0x65   :  { %411 = vmatpush.msra.mxu0 %v388_v19 }
  0x67   :  { %412 = vmatpush.msra.mxu0 %v387_v20 }
  0x69   :  { %413 = vmatpush.msra.mxu0 %v386_v21 }
  0x6b   :  { %414 = vmatpush.msra.mxu0 %v385_v22 }
  0x6d   :  { %415 = vmatpush.msra.mxu0 %v384_v23 }
  0x6f   :  { %416 = vmatpush.msra.mxu0 %v383_v24 }
  0x71   :  { %417 = vmatpush.msra.mxu0 %v382_v25 }
  0xc5   :  { %v238_v27 = vpop.f32.mrf.mxu0 }
  0xc6   :  { %v239_v28 = vadd.f32 %v451_v26, %v238_v27 }
  0xc8   :  { %v258_v29 = vpop.f32.mrf.mxu1 }
  0xc9   :  { %v259_v30 = vadd.f32 %v258_v29, %v239_v28  ;;  %v278_v31 = vpop.f32.mrf.mxu2 }
  0xcb   :  { %v279_v32 = vadd.f32 %v278_v31, %v259_v30 }
  0xcc   :  { %v298_v33 = vpop.f32.mrf.mxu3 }
  0xcd   :  { %v299_v34 = vadd.f32 %v298_v33, %v279_v32 }
  0xcf   :  { %v318_v35 = vpop.f32.mrf.mxu0 }
  0xd0   :  { %v319_v36 = vadd.f32 %v318_v35, %v299_v34 }
  0xd1   :  { %v338_v37 = vpop.f32.mrf.mxu1 }
  0xd2   :  { %v339_v38 = vadd.f32 %v338_v37, %v319_v36 }
  0xd3   :  { %v358_v39 = vpop.f32.mrf.mxu2 }
  0xd4   :  { %v359_v40 = vadd.f32 %v358_v39, %v339_v38 }
  0xd5   :  { %v378_v41 = vpop.f32.mrf.mxu3 }
  0xd6   :  { %v379_v42 = vadd.f32 %v378_v41, %v359_v40 }
  0xd8   :  { %v381_v43 = vmax.f32 %v379_v42, 0.0 }
  0xda   :  { %418 = vmatmul.f32.vlgmr.msra.gmra.mxu0 %v381_v43 }
 0x157   :  { %v419_v45 = vpop.f32.mrf.mxu0 }
 0x158   :  { %v420_v46 = vadd.f32 %v452_v44, %v419_v45 }
 0x15a   :  { %v444_v47 = vclamps-f32 %v420_v46, 1.0 }
 0x15c   :  { %v424_v48 = vpack.c.bf16 %v444_v47, %v444_v47 }
 0x15e   :  { %425 = vst [vmem:[#allocation8] sm:$0x1] %v424_v48 }
 0x15f   :  { %436 = dma.vmem_to_hbm [thread:$0]  %s432_s11, 16, %s434_s14, [#allocation4]  }
 0x160   :  { %553 = dma.done.wait [#allocation4], 16  }
 0x161   :  { %554 = vsyncadd [#allocation4], 4294967280 }
 0x162   :  { %441 = vsyncpa [#allocation3], 1 }
 0x163   :  { %442 = vsyncpa [#allocation6], 1 }
 0x164   :  { %443 = vsyncpa [#allocation4], 1 }

</bundles_post_ra>
